<compile_context>
chip_gen: v7x
topology: tpu7x:2x2x1
jax: 0.10.0
libtpu: 0.0.40
codegen_flags: <defaults>
</compile_context>

<pallas_src>
import jax
import jax.numpy as jnp
from jax import lax
from jax.experimental import pallas as pl
from jax.experimental.pallas import tpu as pltpu


def _sigmoid(x):
    # Plain logistic (exp + divide): numerically equivalent to torch.sigmoid
    # for these magnitudes and guaranteed to lower on Mosaic.
    return 1.0 / (1.0 + jnp.exp(-x))


# ---------------------------------------------------------------------------
# Kernel: T sequential Policy_Network steps, single invocation (no grid)
# ---------------------------------------------------------------------------
def _policy_rollout_kernel(step_ref,            # SMEM (1,)      int32  initial step
                           x_ref,               # VMEM (T*B, 4d) fused [g5|g4|g3|z]
                           mask_ref,            # VMEM (T, B, 1)
                           hx0_ref, cx0_ref,    # VMEM (R, B, H) initial dilated state
                           wih_ref,             # VMEM (4d, 4H)  W_ih^T  (PyTorch gate order i,f,g,o)
                           whh_ref,             # VMEM (H, 4H)   W_hh^T
                           b_ref,               # VMEM (1, 4H)   b_ih + b_hh
                           out_ref,             # VMEM (T, B, H) int32 results (resident)
                           hxo_ref, cxo_ref,    # VMEM (R, B, H) carried/final state
                           xg_ref):             # VMEM scratch (T, B, 4H)
    T, B, H = out_ref.shape
    R = hxo_ref.shape[0]
    step0 = step_ref[0]

    # -- hoisted input projection: ONE MXU push covers all T steps ----------
    xg = jnp.dot(x_ref[...], wih_ref[...], preferred_element_type=jnp.float32)
    xg_ref[...] = xg.reshape(T, B, 4 * H)

    # -- seed the carried state (runs once; single kernel invocation) -------
    hxo_ref[...] = hx0_ref[...]
    cxo_ref[...] = cx0_ref[...]

    whh = whh_ref[...]           # (H, 4H), resident in vregs
    bias = b_ref[...]            # (1, 4H)

    def body(t, carry):
        idx = (step0 + t) % R                      # current dilation slot
        m = mask_ref[t]                            # (B, 1)

        # hidden = (mask * hidden[0], mask * hidden[1])  -- all R slots
        hx_m = hxo_ref[...] * m[None, :, :]        # (R, B, H)
        cx_m = cxo_ref[...] * m[None, :, :]
        h_cur = hxo_ref[idx] * m                   # (B, H) current-slot state
        c_cur = cxo_ref[idx] * m

        # LSTMCell gates (PyTorch order i, f, g, o); x-part precomputed.
        gates = (xg_ref[t]
                 + jnp.dot(h_cur, whh, preferred_element_type=jnp.float32)
                 + bias)                           # (B, 4H)

        # Full-vreg nonlinearities, then column selects (all within one vreg
        # at H = 3; keep 4H a multiple of 128 if H is ever scaled up).
        sig = _sigmoid(gates)
        tnh = jnp.tanh(gates)
        i_g = sig[:, 0 * H:1 * H]
        f_g = sig[:, 1 * H:2 * H]
        g_g = tnh[:, 2 * H:3 * H]
        o_g = sig[:, 3 * H:4 * H]

        c_new = f_g * c_cur + i_g * g_g
        h_new = o_g * jnp.tanh(c_new)

        # Write back masked state, then overwrite only the dilation slot.
        hxo_ref[...] = hx_m
        cxo_ref[...] = cx_m
        hxo_ref[idx] = h_new
        cxo_ref[idx] = c_new

        # Dilated-LSTM output: mean pool of the UPDATED state over R groups
        # (read back from the ref so it matches the reference exactly).
        pooled = jnp.mean(hxo_ref[...], axis=0)    # (B, H)

        # (x - min) / (max - min), exact divide (0/0 guarded), round, int32.
        mn = jnp.min(pooled, axis=1, keepdims=True)
        mx = jnp.max(pooled, axis=1, keepdims=True)
        rng = mx - mn
        norm = (pooled - mn) / jnp.where(rng > 0.0, rng, 1.0)
        out_ref[t] = jnp.round(norm).astype(jnp.int32)
        return carry

    lax.fori_loop(0, T, body, 0, unroll=True)


# ---------------------------------------------------------------------------
# Wrappers
# ---------------------------------------------------------------------------
@jax.jit
def _rollout(wih_t, whh_t, bias, x_seq, mask_seq, hx, cx, step_arr):
    T, B, _ = mask_seq.shape
    R, _, H = hx.shape

    vmem = pltpu.MemorySpace.VMEM
    smem = pltpu.MemorySpace.SMEM

    return pl.pallas_call(
        _policy_rollout_kernel,
        out_shape=(
            jax.ShapeDtypeStruct((T, B, H), jnp.int32),    # per-step results
            jax.ShapeDtypeStruct((R, B, H), jnp.float32),  # final hx
            jax.ShapeDtypeStruct((R, B, H), jnp.float32),  # final cx
        ),
        in_specs=[
            pl.BlockSpec(memory_space=smem),   # step
            pl.BlockSpec(memory_space=vmem),   # fused features (T*B, 4d)
            pl.BlockSpec(memory_space=vmem),   # mask sequence
            pl.BlockSpec(memory_space=vmem),   # hx0
            pl.BlockSpec(memory_space=vmem),   # cx0
            pl.BlockSpec(memory_space=vmem),   # W_ih^T
            pl.BlockSpec(memory_space=vmem),   # W_hh^T
            pl.BlockSpec(memory_space=vmem),   # bias
        ],
        out_specs=(
            pl.BlockSpec(memory_space=vmem),
            pl.BlockSpec(memory_space=vmem),
            pl.BlockSpec(memory_space=vmem),
        ),
        scratch_shapes=[pltpu.VMEM((T, B, 4 * H), jnp.float32)],
        # Dilated state updates in place when the caller donates the buffers;
        # XLA inserts a copy otherwise, so semantics are preserved.
        input_output_aliases={3: 1, 4: 2},
    )(step_arr, x_seq, mask_seq, hx, cx, wih_t, whh_t, bias)


def policy_network_rollout(params, goal_5_seq, goal_4_seq, goal_3_seq, z_seq,
                           hidden, mask_seq, step):
    """Runs T sequential Policy_Network steps inside ONE pallas_call.

    goal_*_seq / z_seq : (T, B, d)     mask_seq : (T, B, 1)
    hidden             : ((R, B, H), (R, B, H)) dilated-LSTM state
    Returns (results (T, B, H) int32, new hidden).
    """
    wih_t, whh_t, bias = params
    hx, cx = hidden
    T, B, d = z_seq.shape

    # One XLA concat + free reshape -> fused lane-dense (T*B, 4d) feature slab.
    x_seq = jnp.concatenate([goal_5_seq, goal_4_seq, goal_3_seq, z_seq],
                            axis=-1).reshape(T * B, 4 * d)
    step_arr = jnp.asarray([step], dtype=jnp.int32)

    result, hx_new, cx_new = _rollout(wih_t, whh_t, bias, x_seq, mask_seq,
                                      hx, cx, step_arr)
    return result, (hx_new, cx_new)


def policy_network_forward(params, z, goal_5_norm, goal_4_norm, goal_3_norm,
                           hierarchies_selected, time_horizon, hidden, mask, step):
    """Single-step forward mirroring Policy_Network.forward (T == 1 rollout)."""
    del hierarchies_selected, time_horizon        # unused by the forward pass
    result, hidden_new = policy_network_rollout(
        params,
        goal_5_norm[None], goal_4_norm[None], goal_3_norm[None], z[None],
        hidden, mask[None], step)
    return result[0], hidden_new


# ---------------------------------------------------------------------------
# Parameters (PyTorch nn.LSTMCell layout -> kernel layout, one-time at init)
# ---------------------------------------------------------------------------
def pack_lstm_params(w_ih, w_hh, b_ih, b_hh):
    """PyTorch LSTMCell params -> kernel layout:
       weights pre-transposed to (input, 4H), biases pre-summed to (1, 4H).
       Gate order stays PyTorch's [i, f, g, o]."""
    wih_t = jnp.transpose(w_ih).astype(jnp.float32)       # (4d, 4H)
    whh_t = jnp.transpose(w_hh).astype(jnp.float32)       # (H, 4H)
    bias = (b_ih + b_hh)[None, :].astype(jnp.float32)     # (1, 4H)
    return wih_t, whh_t, bias


def init_policy_params(key, d, hidden_size=3):
    """nn.LSTMCell(d*4, 3) shapes, PyTorch default init U(-1/sqrt(H), 1/sqrt(H))."""
    in_dim = d * 4
    k1, k2, k3, k4 = jax.random.split(key, 4)
    bound = 1.0 / float(hidden_size) ** 0.5
    w_ih = jax.random.uniform(k1, (4 * hidden_size, in_dim), jnp.float32, -bound, bound)
    w_hh = jax.random.uniform(k2, (4 * hidden_size, hidden_size), jnp.float32, -bound, bound)
    b_ih = jax.random.uniform(k3, (4 * hidden_size,), jnp.float32, -bound, bound)
    b_hh = jax.random.uniform(k4, (4 * hidden_size,), jnp.float32, -bound, bound)
    return pack_lstm_params(w_ih, w_hh, b_ih, b_hh)


# ---------------------------------------------------------------------------
# Pure-JAX reference (for correctness checking only)
# ---------------------------------------------------------------------------
def _reference_rollout(params, g5_seq, g4_seq, g3_seq, z_seq, hidden, mask_seq, step):
    wih_t, whh_t, b = params
    hx, cx = hidden
    R, B, H = hx.shape
    T = z_seq.shape[0]
    hi = lax.Precision.HIGHEST
    outs, norms = [], []
    for t in range(T):
        m = mask_seq[t]
        hx = hx * m[None, :, :]
        cx = cx * m[None, :, :]
        idx = (step + t) % R
        h_cur, c_cur = hx[idx], cx[idx]
        x = jnp.concatenate([g5_seq[t], g4_seq[t], g3_seq[t], z_seq[t]], axis=1)
        gates = jnp.dot(x, wih_t, precision=hi) + jnp.dot(h_cur, whh_t, precision=hi) + b
        i_g = jax.nn.sigmoid(gates[:, 0 * H:1 * H])
        f_g = jax.nn.sigmoid(gates[:, 1 * H:2 * H])
        g_g = jnp.tanh(gates[:, 2 * H:3 * H])
        o_g = jax.nn.sigmoid(gates[:, 3 * H:4 * H])
        c_new = f_g * c_cur + i_g * g_g
        h_new = o_g * jnp.tanh(c_new)
        hx = hx.at[idx].set(h_new)
        cx = cx.at[idx].set(c_new)
        pooled = jnp.mean(hx, axis=0)
        mn = pooled.min(axis=1, keepdims=True)
        mx = pooled.max(axis=1, keepdims=True)
        rng = mx - mn
        norm = (pooled - mn) / jnp.where(rng > 0.0, rng, 1.0)
        norms.append(norm)
        outs.append(jnp.round(norm).astype(jnp.int32))
    return jnp.stack(outs), (hx, cx), jnp.stack(norms)


def _check(result, hidden_k, ref_out, ref_hidden, ref_norm):
    assert result.dtype == jnp.int32
    assert bool(jnp.allclose(hidden_k[0], ref_hidden[0], atol=1e-4, rtol=1e-4))
    assert bool(jnp.allclose(hidden_k[1], ref_hidden[1], atol=1e-4, rtol=1e-4))
    # Exact divide in-kernel: only ulp-level matmul/transcendental differences
    # remain, which can flip the round only within a hair of the 0.5 boundary.
    near_boundary = jnp.abs(ref_norm - 0.5) < 1e-3
    assert bool(jnp.all((result == ref_out) | near_boundary))


# ---------------------------------------------------------------------------
if __name__ == "__main__":
    B, d, H, R = 2, 4, 3, 8     # batch, feature dim, hidden (=3), time_horizon
    T = 8                        # rollout length for the amortized call
    step = 5

    key = jax.random.PRNGKey(0)
    kp, kz, k5, k4, k3, kh, kc, ks = jax.random.split(key, 8)

    params = init_policy_params(kp, d, H)

    z = jax.random.normal(kz, (B, d), jnp.float32)
    g5 = jax.random.normal(k5, (B, d), jnp.float32)
    g4 = jax.random.normal(k4, (B, d), jnp.float32)
    g3 = jax.random.normal(k3, (B, d), jnp.float32)
    hx0 = jax.random.normal(kh, (R, B, H), jnp.float32) * 0.1
    cx0 = jax.random.normal(kc, (R, B, H), jnp.float32) * 0.1
    hidden = (hx0, cx0)
    mask = jnp.ones((B, 1), jnp.float32)

    # 1) module-parity single step (T == 1)
    result, hidden1 = policy_network_forward(
        params, z, g5, g4, g3, hierarchies_selected=None, time_horizon=R,
        hidden=hidden, mask=mask, step=step)
    jax.block_until_ready((result, hidden1))
    assert result.shape == (B, H) and result.dtype == jnp.int32
    ref_out, ref_hidden, ref_norm = _reference_rollout(
        params, g5[None], g4[None], g3[None], z[None], hidden, mask[None], step)
    _check(result, hidden1, ref_out[0], ref_hidden, ref_norm[0])

    # 2) amortized rollout: T sequential steps, one pallas_call, everything
    #    resident in VMEM, single writeback of the (T, B, H) result.
    k1, k2, k3b, k4b = jax.random.split(ks, 4)
    g5_seq = jax.random.normal(k1, (T, B, d), jnp.float32)
    g4_seq = jax.random.normal(k2, (T, B, d), jnp.float32)
    g3_seq = jax.random.normal(k3b, (T, B, d), jnp.float32)
    z_seq = jax.random.normal(k4b, (T, B, d), jnp.float32)
    mask_seq = jnp.ones((T, B, 1), jnp.float32).at[3].set(0.0)   # episode reset at t=3

    res_seq, hidden_T = policy_network_rollout(
        params, g5_seq, g4_seq, g3_seq, z_seq, hidden, mask_seq, step)
    jax.block_until_ready((res_seq, hidden_T))
    assert res_seq.shape == (T, B, H) and res_seq.dtype == jnp.int32
    ref_out_s, ref_hidden_s, ref_norm_s = _reference_rollout(
        params, g5_seq, g4_seq, g3_seq, z_seq, hidden, mask_seq, step)
    _check(res_seq, hidden_T, ref_out_s, ref_hidden_s, ref_norm_s)

    print("KERNEL_OK")
</pallas_src>

<mosaic_0001>
module attributes {stable_mosaic.version = 11 : i64} {
  func.func @_policy_rollout_kernel(%arg0: memref<1xi32, #tpu.memory_space<smem>>, %arg1: memref<2x16xf32, #tpu.memory_space<vmem>>, %arg2: memref<1x2x1xf32, #tpu.memory_space<vmem>>, %arg3: memref<8x2x3xf32, #tpu.memory_space<vmem>>, %arg4: memref<8x2x3xf32, #tpu.memory_space<vmem>>, %arg5: memref<16x12xf32, #tpu.memory_space<vmem>>, %arg6: memref<3x12xf32, #tpu.memory_space<vmem>>, %arg7: memref<1x12xf32, #tpu.memory_space<vmem>>, %arg8: memref<1x2x3xi32, #tpu.memory_space<vmem>>, %arg9: memref<8x2x3xf32, #tpu.memory_space<vmem>>, %arg10: memref<8x2x3xf32, #tpu.memory_space<vmem>>, %arg11: memref<1x2x12xf32, #tpu.memory_space<vmem>>) attributes {dimension_semantics = [], scalar_prefetch = 0 : i64, scratch_operands = 1 : i64, tpu.core_type = #tpu.core_type<tc>} {
    %c0 = arith.constant 0 : index
    %0 = memref.load %arg0[%c0] : memref<1xi32, #tpu.memory_space<smem>>
    %c0_0 = arith.constant 0 : index
    %c0_1 = arith.constant 0 : index
    %1 = vector.load %arg1[%c0_0, %c0_1] : memref<2x16xf32, #tpu.memory_space<vmem>>, vector<2x16xf32>
    %c0_2 = arith.constant 0 : index
    %c0_3 = arith.constant 0 : index
    %2 = vector.load %arg5[%c0_2, %c0_3] : memref<16x12xf32, #tpu.memory_space<vmem>>, vector<16x12xf32>
    %cst = arith.constant dense<0.000000e+00> : vector<2x12xf32>
    %3 = tpu.matmul %1, %2, %cst {dimension_numbers = #tpu.dot_dimension_numbers<[1], [0], [0], [1], [0, 0, 1, 1], [], []>} : vector<2x16xf32>, vector<16x12xf32>, vector<2x12xf32> -> vector<2x12xf32>
    %4 = vector.shape_cast %3 : vector<2x12xf32> to vector<1x2x12xf32>
    %c0_4 = arith.constant 0 : index
    %c0_5 = arith.constant 0 : index
    %c0_6 = arith.constant 0 : index
    %5 = vector.load %arg11[%c0_4, %c0_5, %c0_6] : memref<1x2x12xf32, #tpu.memory_space<vmem>>, vector<1x2x12xf32>
    tpu.vector_store %arg11[%c0_4, %c0_5, %c0_6], %4 {strides = array<i32>} : memref<1x2x12xf32, #tpu.memory_space<vmem>>, vector<1x2x12xf32>,
    %c0_7 = arith.constant 0 : index
    %c0_8 = arith.constant 0 : index
    %c0_9 = arith.constant 0 : index
    %6 = vector.load %arg3[%c0_7, %c0_8, %c0_9] : memref<8x2x3xf32, #tpu.memory_space<vmem>>, vector<8x2x3xf32>
    %c0_10 = arith.constant 0 : index
    %c0_11 = arith.constant 0 : index
    %c0_12 = arith.constant 0 : index
    %7 = vector.load %arg9[%c0_10, %c0_11, %c0_12] : memref<8x2x3xf32, #tpu.memory_space<vmem>>, vector<8x2x3xf32>
    tpu.vector_store %arg9[%c0_10, %c0_11, %c0_12], %6 {strides = array<i32>} : memref<8x2x3xf32, #tpu.memory_space<vmem>>, vector<8x2x3xf32>,
    %c0_13 = arith.constant 0 : index
    %c0_14 = arith.constant 0 : index
    %c0_15 = arith.constant 0 : index
    %8 = vector.load %arg4[%c0_13, %c0_14, %c0_15] : memref<8x2x3xf32, #tpu.memory_space<vmem>>, vector<8x2x3xf32>
    %c0_16 = arith.constant 0 : index
    %c0_17 = arith.constant 0 : index
    %c0_18 = arith.constant 0 : index
    %9 = vector.load %arg10[%c0_16, %c0_17, %c0_18] : memref<8x2x3xf32, #tpu.memory_space<vmem>>, vector<8x2x3xf32>
    tpu.vector_store %arg10[%c0_16, %c0_17, %c0_18], %8 {strides = array<i32>} : memref<8x2x3xf32, #tpu.memory_space<vmem>>, vector<8x2x3xf32>,
    %c0_19 = arith.constant 0 : index
    %c0_20 = arith.constant 0 : index
    %10 = vector.load %arg6[%c0_19, %c0_20] : memref<3x12xf32, #tpu.memory_space<vmem>>, vector<3x12xf32>
    %c0_21 = arith.constant 0 : index
    %c0_22 = arith.constant 0 : index
    %11 = vector.load %arg7[%c0_21, %c0_22] : memref<1x12xf32, #tpu.memory_space<vmem>>, vector<1x12xf32>
    %c0_i32 = arith.constant 0 : i32
    %12 = arith.addi %0, %c0_i32 : i32
    %c8_i32 = arith.constant 8 : i32
    %c0_i32_23 = arith.constant 0 : i32
    %13 = arith.cmpi eq, %c8_i32, %c0_i32_23 : i32
    %c1_i32 = arith.constant 1 : i32
    %14 = arith.select %13, %c1_i32, %c8_i32 : i32
    %15 = arith.remsi %12, %14 : i32
    %c0_i32_24 = arith.constant 0 : i32
    %16 = arith.cmpi ne, %15, %c0_i32_24 : i32
    %c0_i32_25 = arith.constant 0 : i32
    %17 = arith.cmpi slt, %15, %c0_i32_25 : i32
    %c0_i32_26 = arith.constant 0 : i32
    %18 = arith.cmpi slt, %14, %c0_i32_26 : i32
    %19 = arith.xori %17, %18 : i1
    %20 = arith.andi %19, %16 : i1
    %21 = arith.addi %15, %14 : i32
    %22 = arith.select %20, %21, %15 : i32
    %23 = arith.index_cast %c0_i32 : i32 to index
    %c0_27 = arith.constant 0 : index
    %c0_28 = arith.constant 0 : index
    %24 = vector.load %arg2[%23, %c0_27, %c0_28] : memref<1x2x1xf32, #tpu.memory_space<vmem>>, vector<1x2x1xf32>
    %25 = vector.shape_cast %24 : vector<1x2x1xf32> to vector<2x1xf32>
    %c0_29 = arith.constant 0 : index
    %c0_30 = arith.constant 0 : index
    %c0_31 = arith.constant 0 : index
    %26 = vector.load %arg9[%c0_29, %c0_30, %c0_31] : memref<8x2x3xf32, #tpu.memory_space<vmem>>, vector<8x2x3xf32>
    %27 = vector.shape_cast %25 : vector<2x1xf32> to vector<1x2x1xf32>
    %28 = vector.broadcast %27 : vector<1x2x1xf32> to vector<8x2x3xf32>
    %29 = arith.mulf %26, %28 : vector<8x2x3xf32>
    %c0_32 = arith.constant 0 : index
    %c0_33 = arith.constant 0 : index
    %c0_34 = arith.constant 0 : index
    %30 = vector.load %arg10[%c0_32, %c0_33, %c0_34] : memref<8x2x3xf32, #tpu.memory_space<vmem>>, vector<8x2x3xf32>
    %31 = vector.shape_cast %25 : vector<2x1xf32> to vector<1x2x1xf32>
    %32 = vector.broadcast %31 : vector<1x2x1xf32> to vector<8x2x3xf32>
    %33 = arith.mulf %30, %32 : vector<8x2x3xf32>
    %34 = arith.index_cast %22 : i32 to index
    %c0_35 = arith.constant 0 : index
    %c0_36 = arith.constant 0 : index
    %35 = vector.load %arg9[%34, %c0_35, %c0_36] : memref<8x2x3xf32, #tpu.memory_space<vmem>>, vector<1x2x3xf32>
    %36 = vector.shape_cast %35 : vector<1x2x3xf32> to vector<2x3xf32>
    %37 = vector.broadcast %25 : vector<2x1xf32> to vector<2x3xf32>
    %38 = arith.mulf %36, %37 : vector<2x3xf32>
    %39 = arith.index_cast %22 : i32 to index
    %c0_37 = arith.constant 0 : index
    %c0_38 = arith.constant 0 : index
    %40 = vector.load %arg10[%39, %c0_37, %c0_38] : memref<8x2x3xf32, #tpu.memory_space<vmem>>, vector<1x2x3xf32>
    %41 = vector.shape_cast %40 : vector<1x2x3xf32> to vector<2x3xf32>
    %42 = vector.broadcast %25 : vector<2x1xf32> to vector<2x3xf32>
    %43 = arith.mulf %41, %42 : vector<2x3xf32>
    %44 = arith.index_cast %c0_i32 : i32 to index
    %c0_39 = arith.constant 0 : index
    %c0_40 = arith.constant 0 : index
    %45 = vector.load %arg11[%44, %c0_39, %c0_40] : memref<1x2x12xf32, #tpu.memory_space<vmem>>, vector<1x2x12xf32>
    %46 = vector.shape_cast %45 : vector<1x2x12xf32> to vector<2x12xf32>
    %cst_41 = arith.constant dense<0.000000e+00> : vector<2x12xf32>
    %47 = tpu.matmul %38, %10, %cst_41 {dimension_numbers = #tpu.dot_dimension_numbers<[1], [0], [0], [1], [0, 0, 1, 1], [], []>} : vector<2x3xf32>, vector<3x12xf32>, vector<2x12xf32> -> vector<2x12xf32>
    %48 = arith.addf %46, %47 : vector<2x12xf32>
    %49 = vector.broadcast %11 : vector<1x12xf32> to vector<2x12xf32>
    %50 = arith.addf %48, %49 : vector<2x12xf32>
    %cst_42 = arith.constant 0.000000e+00 : f32
    %51 = vector.broadcast %cst_42 : f32 to vector<2x12xf32>
    %52 = arith.subf %51, %50 : vector<2x12xf32>
    %53 = math.exp %52 : vector<2x12xf32>
    %cst_43 = arith.constant 1.000000e+00 : f32
    %54 = vector.broadcast %cst_43 : f32 to vector<2x12xf32>
    %55 = arith.addf %54, %53 : vector<2x12xf32>
    %cst_44 = arith.constant 1.000000e+00 : f32
    %56 = vector.broadcast %cst_44 : f32 to vector<2x12xf32>
    %57 = arith.divf %56, %55 : vector<2x12xf32>
    %58 = math.tanh %50 : vector<2x12xf32>
    %59 = vector.extract_strided_slice %57 {offsets = [0, 0], sizes = [2, 3], strides = [1, 1]} : vector<2x12xf32> to vector<2x3xf32>
    %60 = vector.extract_strided_slice %57 {offsets = [0, 3], sizes = [2, 3], strides = [1, 1]} : vector<2x12xf32> to vector<2x3xf32>
    %61 = vector.extract_strided_slice %58 {offsets = [0, 6], sizes = [2, 3], strides = [1, 1]} : vector<2x12xf32> to vector<2x3xf32>
    %62 = vector.extract_strided_slice %57 {offsets = [0, 9], sizes = [2, 3], strides = [1, 1]} : vector<2x12xf32> to vector<2x3xf32>
    %63 = arith.mulf %60, %43 : vector<2x3xf32>
    %64 = arith.mulf %59, %61 : vector<2x3xf32>
    %65 = arith.addf %63, %64 : vector<2x3xf32>
    %66 = math.tanh %65 : vector<2x3xf32>
    %67 = arith.mulf %62, %66 : vector<2x3xf32>
    %c0_45 = arith.constant 0 : index
    %c0_46 = arith.constant 0 : index
    %c0_47 = arith.constant 0 : index
    %68 = vector.load %arg9[%c0_45, %c0_46, %c0_47] : memref<8x2x3xf32, #tpu.memory_space<vmem>>, vector<8x2x3xf32>
    tpu.vector_store %arg9[%c0_45, %c0_46, %c0_47], %29 {strides = array<i32>} : memref<8x2x3xf32, #tpu.memory_space<vmem>>, vector<8x2x3xf32>,
    %c0_48 = arith.constant 0 : index
    %c0_49 = arith.constant 0 : index
    %c0_50 = arith.constant 0 : index
    %69 = vector.load %arg10[%c0_48, %c0_49, %c0_50] : memref<8x2x3xf32, #tpu.memory_space<vmem>>, vector<8x2x3xf32>
    tpu.vector_store %arg10[%c0_48, %c0_49, %c0_50], %33 {strides = array<i32>} : memref<8x2x3xf32, #tpu.memory_space<vmem>>, vector<8x2x3xf32>,
    %70 = arith.index_cast %22 : i32 to index
    %c0_51 = arith.constant 0 : index
    %c0_52 = arith.constant 0 : index
    %71 = vector.load %arg9[%70, %c0_51, %c0_52] : memref<8x2x3xf32, #tpu.memory_space<vmem>>, vector<1x2x3xf32>
    %72 = vector.shape_cast %71 : vector<1x2x3xf32> to vector<2x3xf32>
    %73 = vector.shape_cast %67 : vector<2x3xf32> to vector<1x2x3xf32>
    tpu.vector_store %arg9[%70, %c0_51, %c0_52], %73 {strides = array<i32>} : memref<8x2x3xf32, #tpu.memory_space<vmem>>, vector<1x2x3xf32>,
    %74 = arith.index_cast %22 : i32 to index
    %c0_53 = arith.constant 0 : index
    %c0_54 = arith.constant 0 : index
    %75 = vector.load %arg10[%74, %c0_53, %c0_54] : memref<8x2x3xf32, #tpu.memory_space<vmem>>, vector<1x2x3xf32>
    %76 = vector.shape_cast %75 : vector<1x2x3xf32> to vector<2x3xf32>
    %77 = vector.shape_cast %65 : vector<2x3xf32> to vector<1x2x3xf32>
    tpu.vector_store %arg10[%74, %c0_53, %c0_54], %77 {strides = array<i32>} : memref<8x2x3xf32, #tpu.memory_space<vmem>>, vector<1x2x3xf32>,
    %c0_55 = arith.constant 0 : index
    %c0_56 = arith.constant 0 : index
    %c0_57 = arith.constant 0 : index
    %78 = vector.load %arg9[%c0_55, %c0_56, %c0_57] : memref<8x2x3xf32, #tpu.memory_space<vmem>>, vector<8x2x3xf32>
    %cst_58 = arith.constant dense<0.000000e+00> : vector<2x3xf32>
    %79 = vector.multi_reduction <add>, %78, %cst_58 [0] : vector<8x2x3xf32> to vector<2x3xf32>
    %cst_59 = arith.constant 8.000000e+00 : f32
    %80 = vector.broadcast %cst_59 : f32 to vector<2x3xf32>
    %81 = arith.divf %79, %80 : vector<2x3xf32>
    %cst_60 = arith.constant dense<0x7F800000> : vector<2xf32>
    %82 = vector.multi_reduction <minimumf>, %81, %cst_60 [1] : vector<2x3xf32> to vector<2xf32>
    %83 = vector.shape_cast %82 : vector<2xf32> to vector<2x1xf32>
    %cst_61 = arith.constant dense<0xFF800000> : vector<2xf32>
    %84 = vector.multi_reduction <maximumf>, %81, %cst_61 [1] : vector<2x3xf32> to vector<2xf32>
    %85 = vector.shape_cast %84 : vector<2xf32> to vector<2x1xf32>
    %86 = arith.subf %85, %83 : vector<2x1xf32>
    %87 = vector.broadcast %83 : vector<2x1xf32> to vector<2x3xf32>
    %88 = arith.subf %81, %87 : vector<2x3xf32>
    %cst_62 = arith.constant 0.000000e+00 : f32
    %89 = vector.broadcast %cst_62 : f32 to vector<2x1xf32>
    %90 = arith.cmpf ogt, %86, %89 : vector<2x1xf32>
    %cst_63 = arith.constant 1.000000e+00 : f32
    %91 = vector.broadcast %cst_63 : f32 to vector<2x1xf32>
    %92 = arith.select %90, %86, %91 : vector<2x1xi1>, vector<2x1xf32>
    %93 = vector.broadcast %92 : vector<2x1xf32> to vector<2x3xf32>
    %94 = arith.divf %88, %93 : vector<2x3xf32>
    %95 = math.roundeven %94 : vector<2x3xf32>
    %96 = arith.fptosi %95 : vector<2x3xf32> to vector<2x3xi32>
    %97 = arith.index_cast %c0_i32 : i32 to index
    %c0_64 = arith.constant 0 : index
    %c0_65 = arith.constant 0 : index
    %98 = vector.load %arg8[%97, %c0_64, %c0_65] : memref<1x2x3xi32, #tpu.memory_space<vmem>>, vector<1x2x3xi32>
    %99 = vector.shape_cast %98 : vector<1x2x3xi32> to vector<2x3xi32>
    %100 = vector.shape_cast %96 : vector<2x3xi32> to vector<1x2x3xi32>
    tpu.vector_store %arg8[%97, %c0_64, %c0_65], %100 {strides = array<i32>} : memref<1x2x3xi32, #tpu.memory_space<vmem>>, vector<1x2x3xi32>,
    %c1_i32_66 = arith.constant 1 : i32
    return
  }
}

</mosaic_0001>

<bundles_post_ra>
// kernel: _rollout.1
= control target key start
LH: loop header
LB: loop body
LE: loop exit
PB: predicated region body
PF: predicated region fallthrough
CT: control target
= control target key end

     0   :  { %v488_v3 = vmov 0   ;;  %v489_v4 = vmov 0.0|0.0   ;;  %vm38_vm0 = vcmask 130048   ;;  %vm490_vm1 = vmmov 0   ;;  %s871_s0 = inlined_call_operand.<no memory space> [shape: s32[1], index: 0, kind: input, shape index: {}]   ;;  %s872_s1 = inlined_call_operand.vmem [shape: f32[2,16], index: 1, kind: input, shape index: {}]   ;;  %s873_s2 = inlined_call_operand.vmem [shape: f32[1,2,1], index: 2, kind: input, shape index: {}]   ;;  %s874_s3 = inlined_call_operand.vmem [shape: f32[8,2,3], index: 3, kind: input, shape index: {}, may-alias: {3,9}]   ;;  %s875_s4 = inlined_call_operand.vmem [shape: f32[8,2,3], index: 4, kind: input, shape index: {}, may-alias: {4,10}]   ;;  %s876_s5 = inlined_call_operand.vmem [shape: f32[16,12], index: 5, kind: input, shape index: {}]   ;;  %s877_s6 = inlined_call_operand.vmem [shape: f32[3,12], index: 6, kind: input, shape index: {}]   ;;  %s878_s7 = inlined_call_operand.vmem [shape: f32[1,12], index: 7, kind: input, shape index: {}]   ;;  %s879_s8 = inlined_call_operand.hbm [shape: s32[1,2,3], index: 8, kind: output, shape index: {0}]   ;;  %s880_s9 = inlined_call_operand.vmem [shape: f32[8,2,3], index: 9, kind: output, shape index: {1}, may-alias: {3,9}]   ;;  %s881_s10 = inlined_call_operand.vmem [shape: f32[8,2,3], index: 10, kind: output, shape index: {2}, may-alias: {4,10}]  }
   0x1   :  { %v161_v0 = vld [vmem:[%s873_s2] sm:$0x3]  ;;  %v37_v2 = vld [vmem:[%s876_s5 + $0x8] sm:$0xff]  ;;  %453 = vset.pattern.permute.xlu0 %v488_v3  ;;  %437 = vmatprep.subr.bf16.mxu0 %v489_v4  ;;  %v491_v7 = vmov 0.0   ;;  %vm211_vm2 = vcmask 1042432   ;;  %vm122_vm3 = vcmask 17408  }
   0x2   :  { %v36_v1 = vld [vmem:[%s876_s5] sm:$0xff]  ;;  %172 = vperm.xlu0 %453, %v161_v0   ;;  %429 = vmatprep.mubr.msk.f32.mxu0 %vm490_vm1, %v491_v7 }
   0x3   :  { %v438_v5 = vpack.c.bf16 %v37_v2, %v36_v1  ;;  %v35_v6 = vld [vmem:[%s872_s1] sm:$0x3]  ;;  %432 = vmatprep.subr.mxu1 %v491_v7  ;;  %v132_v10 = vld [vmem:[%s875_s4 + $0x2] sm:$0x3]  ;;  %v133_v11 = vld [vmem:[%s875_s4 + $0x4] sm:$0x3]  ;;  %434 = vmatprep.mubr.msk.f32.mxu1 %vm490_vm1, %v491_v7 }
   0x4   :  { %v147_v8 = vld [vmem:[%s877_s6] sm:$0x7]  ;;  %v134_v12 = vld [vmem:[%s875_s4 + $0x6] sm:$0x3]  ;;  %v116_v19 = vld [vmem:[%s874_s3 + $0x4] sm:$0x3] }
   0x5   :  { %v131_v9 = vld [vmem:[%s875_s4] sm:$0x3]  ;;  %439 = vmatpush3.bf16.msra.mxu0 %v438_v5  ;;  %433 = vmatpush3.msk.msra.mxu1 %vm211_vm2, %v147_v8  ;;  %v115_v18 = vld [vmem:[%s874_s3 + $0x2] sm:$0x3]  ;;  %v117_v20 = vld [vmem:[%s874_s3 + $0x6] sm:$0x3] }
   0x6   :  { %139 = vst.msk [vmem:[%s881_s10] sm:$0x3] %vm122_vm3, %v131_v9  ;;  %v114_v17 = vld [vmem:[%s874_s3] sm:$0x3] }
   0x7   :  { %123 = vst.msk [vmem:[%s880_s9] sm:$0x3] %vm122_vm3, %v114_v17 }
   0x8   :  { %430 = vmatmul.mubr.msk.f32.vlgmr.msra.gmra.mrb[0].mxu0 %vm38_vm0, %v35_v6 }
   0xd   :  { %v135_v13 = vld [vmem:[%s875_s4 + $0x8] sm:$0x3]  ;;  %v136_v14 = vld [vmem:[%s875_s4 + $0xa] sm:$0x3]  ;;  %v137_v15 = vld [vmem:[%s875_s4 + $0xc] sm:$0x3] }
   0xe   :  { %140 = vst.msk [vmem:[%s881_s10 + $0x2] sm:$0x3] %vm122_vm3, %v132_v10  ;;  %141 = vst.msk [vmem:[%s881_s10 + $0x4] sm:$0x3] %vm122_vm3, %v133_v11  ;;  %v118_v21 = vld [vmem:[%s874_s3 + $0x8] sm:$0x3] }
   0xf   :  { %142 = vst.msk [vmem:[%s881_s10 + $0x6] sm:$0x3] %vm122_vm3, %v134_v12  ;;  %v119_v22 = vld [vmem:[%s874_s3 + $0xa] sm:$0x3] }
  0x10   :  { %124 = vst.msk [vmem:[%s880_s9 + $0x2] sm:$0x3] %vm122_vm3, %v115_v18  ;;  %125 = vst.msk [vmem:[%s880_s9 + $0x4] sm:$0x3] %vm122_vm3, %v116_v19 }
  0x11   :  { %126 = vst.msk [vmem:[%s880_s9 + $0x6] sm:$0x3] %vm122_vm3, %v117_v20 }
  0x16   :  { %v138_v16 = vld [vmem:[%s875_s4 + $0xe] sm:$0x3] }
  0x17   :  { %143 = vst.msk [vmem:[%s881_s10 + $0x8] sm:$0x3] %vm122_vm3, %v135_v13  ;;  %144 = vst.msk [vmem:[%s881_s10 + $0xa] sm:$0x3] %vm122_vm3, %v136_v14 }
  0x18   :  { %145 = vst.msk [vmem:[%s881_s10 + $0xc] sm:$0x3] %vm122_vm3, %v137_v15  ;;  %146 = vst.msk [vmem:[%s881_s10 + $0xe] sm:$0x3] %vm122_vm3, %v138_v16  ;;  %v120_v23 = vld [vmem:[%s874_s3 + $0xc] sm:$0x3] }
  0x19   :  { %v121_v24 = vld [vmem:[%s874_s3 + $0xe] sm:$0x3] }
  0x1a   :  { %127 = vst.msk [vmem:[%s880_s9 + $0x8] sm:$0x3] %vm122_vm3, %v118_v21  ;;  %128 = vst.msk [vmem:[%s880_s9 + $0xa] sm:$0x3] %vm122_vm3, %v119_v22 }
  0x1b   :  { %129 = vst.msk [vmem:[%s880_s9 + $0xc] sm:$0x3] %vm122_vm3, %v120_v23  ;;  %130 = vst.msk [vmem:[%s880_s9 + $0xe] sm:$0x3] %vm122_vm3, %v121_v24 }
  0x1c   :  { %17 = vsyncpa [#allocation5], 0  ;;  %s150_s14 = ssub.s32 0, %s871_s0  ;;  %p149_p0 = scmp.lt.s32.totalorder %s871_s0, 0  ;;  %vm207_vm4 = vcmask 23552   ;;  %vm112_vm5 = vcmask 91136  }
  0x1d   :  { %s413_s17 = smin.u32 %s150_s14, %s871_s0  ;;  %v184_v25 = vld [vmem:[%s881_s10 + $0x2] sm:$0x3]  ;;  %v185_v26 = vld [vmem:[%s881_s10 + $0x4] sm:$0x3]  ;;  %v186_v27 = vld [vmem:[%s881_s10 + $0x6] sm:$0x3] }
  0x1e   :  { %s152_s18 = sand.u32 7, %s413_s17   ;;  %v187_v28 = vld [vmem:[%s881_s10 + $0x8] sm:$0x3]  ;;  %v188_v29 = vld [vmem:[%s881_s10 + $0xa] sm:$0x3]  ;;  %s492_s22 = smov 3  }
  0x1f   :  { %s153_s2 = ssub.s32 0, %s152_s18  ;;  %v189_v30 = vld [vmem:[%s881_s10 + $0xc] sm:$0x3]  ;;  %v183_v31 = vld [vmem:[%s881_s10] sm:$0x3]  ;;  %s493_s19 = smov 122  }
  0x20   :  { %s883_s2 = smov (!%p149_p0, %s153_s2), %s152_s18  ;;  %v190_v32 = vld [vmem:[%s881_s10 + $0xe] sm:$0x3]  ;;  %v162_v34 = vld [vmem:[%s880_s9] sm:$0x3]  ;;  %v163_v37 = vld [vmem:[%s880_s9 + $0x2] sm:$0x3] }
  0x21   :  { %p415_p1 = scmp.lt.s32.totalorder %s883_s2, 0  ;;  %s159_s21 = sadd.s32 8, %s883_s2  ;;  %v164_v38 = vld [vmem:[%s880_s9 + $0x4] sm:$0x3]  ;;  %v165_v43 = vld [vmem:[%s880_s9 + $0x6] sm:$0x3] }
  0x22   :  { %v166_v44 = vld [vmem:[%s880_s9 + $0x8] sm:$0x3]  ;;  %v167_v45 = vld [vmem:[%s880_s9 + $0xa] sm:$0x3]  ;;  %v168_v50 = vld [vmem:[%s880_s9 + $0xc] sm:$0x3] }
  0x23   :  { %s885_s21 = smov (!%p415_p1, %s159_s21), %s883_s2  ;;  %v169_v51 = vld [vmem:[%s880_s9 + $0xe] sm:$0x3]  ;;  %v419_v1 = vld [vmem:[%s878_s7] ss:$0 sm:$0xff]  ;;  %s494_s7 = smov 6  }
  0x24   :  { %s416_s5 = sshll.u32 %s885_s21, 1  ;;  %s495_s20 = smov 119  }
  0x25   :  { %s693_s24 = scalar_lea.vmem %s881_s10, %s416_s5  ;;  %s707_s29 = scalar_lea.vmem %s880_s9, %s416_s5 }
  0x26   :  { %v204_v33 = vld [vmem:[%s693_s24] sm:$0x3]  ;;  %s496_s11 = smov 125  }
  0x27   :  { %v201_v36 = vld [vmem:[%s707_s29] sm:$0x3] }
  0x81   :  { %v173_v35 = vpop.permute.xlu0 %172 }
  0x82   :  { %v192_v39 = vmul.f32 %v184_v25, %v173_v35  ;;  %v193_v40 = vmul.f32 %v185_v26, %v173_v35  ;;  %v194_v41 = vmul.f32 %v186_v27, %v173_v35  ;;  %v195_v42 = vmul.f32 %v187_v28, %v173_v35 }
  0x83   :  { %v196_v46 = vmul.f32 %v188_v29, %v173_v35  ;;  %v197_v47 = vmul.f32 %v189_v30, %v173_v35  ;;  %v198_v48 = vmul.f32 %v190_v32, %v173_v35  ;;  %v205_v49 = vmul.f32 %v204_v33, %v173_v35 }
  0x84   :  { %330 = vst.msk [vmem:[%s881_s10 + $0x2] sm:$0x3] %vm122_vm3, %v192_v39  ;;  %331 = vst.msk [vmem:[%s881_s10 + $0x4] sm:$0x3] %vm122_vm3, %v193_v40  ;;  %v191_v52 = vmul.f32 %v183_v31, %v173_v35  ;;  %v202_v53 = vmul.f32 %v201_v36, %v173_v35  ;;  %v175_v54 = vmul.f32 %v173_v35, %v162_v34 }
  0x85   :  { %332 = vst.msk [vmem:[%s881_s10 + $0x6] sm:$0x3] %vm122_vm3, %v194_v41  ;;  %333 = vst.msk [vmem:[%s881_s10 + $0x8] sm:$0x3] %vm122_vm3, %v195_v42  ;;  %v176_v55 = vmul.f32 %v173_v35, %v163_v37  ;;  %301 = vrot.lane.b32.xlu1 %v205_v49, %s492_s22  ;;  %v177_v56 = vmul.f32 %v173_v35, %v164_v38  ;;  %v178_v57 = vmul.f32 %v173_v35, %v165_v43 }
  0x86   :  { %334 = vst.msk [vmem:[%s881_s10 + $0xa] sm:$0x3] %vm122_vm3, %v196_v46  ;;  %335 = vst.msk [vmem:[%s881_s10 + $0xc] sm:$0x3] %vm122_vm3, %v197_v47  ;;  %v179_v58 = vmul.f32 %v173_v35, %v166_v44  ;;  %v180_v59 = vmul.f32 %v173_v35, %v167_v45  ;;  %435 = vmatmul.mubr.msk.f32.vlgmr.msra.gmra.mrb[0].mxu1 %vm207_vm4, %v202_v53  ;;  %v181_v60 = vmul.f32 %v173_v35, %v168_v50 }
  0x87   :  { %336 = vst.msk [vmem:[%s881_s10 + $0xe] sm:$0x3] %vm122_vm3, %v198_v48  ;;  %329 = vst.msk [vmem:[%s881_s10] sm:$0x3] %vm122_vm3, %v191_v52  ;;  %v182_v61 = vmul.f32 %v173_v35, %v169_v51 }
  0x88   :  { %321 = vst.msk [vmem:[%s880_s9] sm:$0x3] %vm122_vm3, %v175_v54  ;;  %322 = vst.msk [vmem:[%s880_s9 + $0x2] sm:$0x3] %vm122_vm3, %v176_v55 }
  0x89   :  { %323 = vst.msk [vmem:[%s880_s9 + $0x4] sm:$0x3] %vm122_vm3, %v177_v56  ;;  %324 = vst.msk [vmem:[%s880_s9 + $0x6] sm:$0x3] %vm122_vm3, %v178_v57 }
  0x8a   :  { %325 = vst.msk [vmem:[%s880_s9 + $0x8] sm:$0x3] %vm122_vm3, %v179_v58  ;;  %326 = vst.msk [vmem:[%s880_s9 + $0xa] sm:$0x3] %vm122_vm3, %v180_v59 }
  0x8b   :  { %327 = vst.msk [vmem:[%s880_s9 + $0xc] sm:$0x3] %vm122_vm3, %v181_v60  ;;  %328 = vst.msk [vmem:[%s880_s9 + $0xe] sm:$0x3] %vm122_vm3, %v182_v61 }
  0xdb   :  { %v108_v62 = vpop.f32.mrb[0].mxu0 }
  0xdc   :  { %113 = vst.msk [vmem:[#allocation2] sm:$0x3] %vm112_vm5, %v108_v62  ;;  %v431_v63 = vpop.f32.mrb[1].mxu0 }
  0xe3   :  { %v206_v0 = vld [vmem:[#allocation2] sm:$0x3] }
  0xf7   :  { %v302_v14 = vpop.permute.xlu1 %301 }
 0x159   :  { %v281_v2 = vpop.f32.mrb[0].mxu1 }
 0x15a   :  { %v285_v3 = vadd.f32 %v281_v2, %v206_v0  ;;  %v436_v4 = vpop.f32.mrb[1].mxu1 }
 0x15c   :  { %v292_v5 = vadd.f32 %v419_v1, %v285_v3 }
 0x15e   :  { %454 = vtanh.f32 %v292_v5  ;;  %v293_v7 = vsub.f32 0.0, %v292_v5 }
 0x160   :  { %v294_v8 = vmul.f32 1.442695, %v293_v7 }
 0x162   :  { %456 = vpow2.f32 %v294_v8 }
 0x168   :  { %v455_v6 = vpop.eup %454 }
 0x169   :  { %306 = vrot.lane.b32.xlu0 %v455_v6, %s493_s19 }
 0x16c   :  { %v457_v9 = vpop.eup %456 }
 0x16d   :  { %v296_v10 = vadd.f32 1.0, %v457_v9 }
 0x16f   :  { %458 = vrcp.f32 %v296_v10 }
 0x179   :  { %v459_v11 = vpop.eup %458 }
 0x17a   :  { %v304_v15 = vmul.f32 %v459_v11, %v302_v14 }
 0x1db   :  { %v307_v12 = vpop.permute.xlu0 %306 }
 0x1dc   :  { %v309_v13 = vmul.f32 %v459_v11, %v307_v12 }
 0x1de   :  { %311 = vrot.lane.b32.xlu1 %v309_v13, %s492_s22 }
 0x250   :  { %v312_v16 = vpop.permute.xlu1 %311 }
 0x251   :  { %v314_v17 = vadd.f32 %v312_v16, %v304_v15 }
 0x253   :  { %460 = vtanh.f32 %v314_v17 }
 0x25d   :  { %v461_v18 = vpop.eup %460 }
 0x25e   :  { %317 = vrot.lane.b32.xlu0 %v461_v18, %s494_s7 }
 0x2d0   :  { %v318_v19 = vpop.permute.xlu0 %317 }
 0x2d1   :  { %v320_v20 = vmul.f32 %v459_v11, %v318_v19 }
 0x2d3   :  { %338 = vrot.lane.b32.xlu1 %v320_v20, %s495_s20 }
 0x345   :  { %v339_v21 = vpop.permute.xlu1 %338 }
 0x346   :  { %341 = vst.msk [vmem:[%s707_s29] sm:$0x3] %vm122_vm3, %v339_v21 }
 0x34d   :  { %v347_v22 = vld [vmem:[%s880_s9] sm:$0x3]  ;;  %v348_v23 = vld [vmem:[%s880_s9 + $0x2] sm:$0x3]  ;;  %v349_v24 = vld [vmem:[%s880_s9 + $0x4] sm:$0x3] }
 0x34e   :  { %v355_v25 = vsel %vm122_vm3, %v347_v22, 0.0  ;;  %v356_v26 = vsel %vm122_vm3, %v348_v23, 0.0  ;;  %v350_v27 = vld [vmem:[%s880_s9 + $0x6] sm:$0x3]  ;;  %v358_v29 = vsel %vm122_vm3, %v349_v24, 0.0 }
 0x34f   :  { %v357_v28 = vadd.f32 %v356_v26, %v355_v25  ;;  %v351_v30 = vld [vmem:[%s880_s9 + $0x8] sm:$0x3]  ;;  %v360_v32 = vsel %vm122_vm3, %v350_v27, 0.0  ;;  %v352_v33 = vld [vmem:[%s880_s9 + $0xa] sm:$0x3] }
 0x350   :  { %v362_v35 = vsel %vm122_vm3, %v351_v30, 0.0  ;;  %v353_v36 = vld [vmem:[%s880_s9 + $0xc] sm:$0x3]  ;;  %v364_v38 = vsel %vm122_vm3, %v352_v33, 0.0  ;;  %v354_v39 = vld [vmem:[%s880_s9 + $0xe] sm:$0x3] }
 0x351   :  { %v359_v31 = vadd.f32 %v358_v29, %v357_v28  ;;  %v366_v41 = vsel %vm122_vm3, %v353_v36, 0.0  ;;  %v368_v43 = vsel %vm122_vm3, %v354_v39, 0.0  ;;  %s497_s9 = smov [#allocation4]  }
 0x352   :  { %s392_s12 = sshll.u32 %s497_s9, 4  ;;  %s393_s12 = int_to_ptr.vmem [resolvable:$true] %s392_s12 }
 0x353   :  { %v361_v34 = vadd.f32 %v360_v32, %v359_v31  ;;  %s464_s3 = scalar_lea.vmem %s393_s12, 32  ;;  %p469_p3 = scmp.lt.s32.totalorder %s393_s12, %s393_s12 }
 0x354   :  { %p465_p2 = scmp.ne.s32.totalorder %s393_s12, %s464_s3  ;;  %p470_p4 = scmp.lt.s32.totalorder %s464_s3, %s464_s3 }
 0x355   :  { %v363_v37 = vadd.f32 %v362_v35, %v361_v34 }
 0x356   :  { %p471_p5 = por %p470_p4, %p469_p3 }
 0x357   :  { %v365_v40 = vadd.f32 %v364_v38, %v363_v37 }
 0x358   :  { %p472_p6 = pnand %p471_p5, %p465_p2 }
 0x359   :  { %v367_v42 = vadd.f32 %v366_v41, %v365_v40 }
 0x35b   :  { %v369_v44 = vadd.f32 %v368_v43, %v367_v42 }
 0x35d   :  { %v371_v45 = vmul.f32 0.125, %v369_v44 }
 0x35f   :  { %v375_v46 = vsel %vm122_vm3, %v371_v45, -inf  ;;  %v372_v47 = vsel %vm122_vm3, %v371_v45, inf }
 0x360   :  { %376 = vmax.xlane.f32.xlu1 %v375_v46  ;;  %373 = vmin.xlane.f32.xlu0 %v372_v47 }
 0x376   :  { %343 = vrot.lane.b32.xlu0 %v314_v17, %s496_s11 }
 0x3ed   :  { %v377_v48 = vpop.xlane.xlu1 %376  ;;  %v374_v49 = vpop.xlane.xlu0 %373 }
 0x3ee   :  { %v378_v50 = vsub.f32 %v377_v48, %v374_v49  ;;  %v379_v53 = vsub.f32 %v371_v45, %v374_v49 }
 0x3f0   :  { %vm380_vm6 = vcmp.gt.f32.partialorder %v378_v50, 0.0 }
 0x3f1   :  { %v381_v51 = vsel %vm380_vm6, %v378_v50, 1.0  ;;  %v344_v52 = vpop.permute.xlu0 %343 }
 0x3f2   :  { %462 = vrcp.f32 %v381_v51  ;;  %346 = vst.msk [vmem:[%s693_s24] sm:$0x3] %vm122_vm3, %v344_v52 }
 0x3fc   :  { %v463_v54 = vpop.eup %462 }
 0x3fd   :  { %v383_v55 = vmul.f32 %v463_v54, %v379_v53 }
 0x3ff   :  { %v442_v56 = vcvt.f32.s32 %v383_v55 }
 0x401   :  { %385 = vst.msk [vmem:[#allocation4] sm:$0x3] %vm122_vm3, %v442_v56 }
 0x402   :  { %475 = shalt.err (!%p472_p6)
}
 0x403   :  { %s476_s24 = scalar_lea.hbm %s879_s8, 32 }
 0x404   :  { %p477_p7 = scmp.ne.s32.totalorder %s879_s8, %s476_s24  ;;  %p480_p8 = scmp.lt.u32.totalorder %s476_s24, %s879_s8 }
 0x406   :  { %p482_p9 = pnand %p480_p8, %p477_p7 }
 0x408   :  { %485 = shalt.err (!%p482_p9)
}
 0x409   :  { %395 = dma.vmem_to_hbm [thread:$0]  %s393_s12, 32, %s879_s8, [#allocation5]  }
 0x40a   :  { %486 = dma.done.wait [#allocation5], 32  }
 0x40b   :  { %487 = vsyncadd [#allocation5], 4294967264 }
 0x40c   :  { %407 = vsyncpa [#allocation5], 1 }

</bundles_post_ra>
